<compile_context>
chip_gen: v6e
topology: v6e:2x2x1
jax: 0.10.0
libtpu: 0.0.40
codegen_flags: <defaults>
</compile_context>

<pallas_src>
import functools
import math

import jax
import jax.numpy as jnp
from jax.experimental import pallas as pl
from jax.experimental.pallas import tpu as pltpu


def _round_up(n, m):
    return ((n + m - 1) // m) * m


# ---------------------------------------------------------------------------
# Fused Pallas kernel: conv(all K) + ReLU + max-pool + concat + FC
# ---------------------------------------------------------------------------
def _fused_cnn_kernel(e_ref, wc_ref, bc_ref, wf_ref, bf_ref, o_ref,
                      *, KS, Co, col_offsets):
    # e_ref : (Bt, L, D)       bf16  embeddings (batch tile)
    # wc_ref: (D, C_pad)       bf16  fused conv weights; column off_i + k*Co + c
    #                                holds tap-k of output channel c of kernel i.
    # bc_ref: (1, F_pad)       f32   conv biases per pooled feature (zero-padded)
    # wf_ref: (F_pad, LBL_pad) f32   fc weight (zero-padded rows/cols)
    # bf_ref: (1, LBL_pad)     f32   fc bias (zero-padded)
    # o_ref : (Bt, LBL_pad)    f32   padded logits (caller slices [:, :labels])
    e = e_ref[...]
    Bt, L, D = e.shape
    C_pad = wc_ref.shape[1]
    F_pad = bc_ref.shape[1]

    # Single lane-dense MXU matmul for every conv kernel and every tap:
    #   y[b, t, off_i + k*Co + c] = <e[b, t, :], w_i[c, k, :]>
    y = jnp.dot(e.reshape(Bt * L, D), wc_ref[...],
                preferred_element_type=jnp.float32)
    y = y.reshape(Bt, L, C_pad)

    # "valid" conv over time = sum of K time-shifted column slices; then pool.
    pooled = []
    for i, K in enumerate(KS):
        off = col_offsets[i]
        L_out = L - K + 1
        acc = y[:, 0:L_out, off:off + Co]
        for k in range(1, K):
            acc = acc + y[:, k:k + L_out, off + k * Co:off + (k + 1) * Co]
        pooled.append(jnp.max(acc, axis=1))                    # (Bt, Co)

    F = len(KS) * Co
    if F_pad > F:
        pooled.append(jnp.zeros((Bt, F_pad - F), jnp.float32))  # keep pad lanes 0
    feats = jnp.concatenate(pooled, axis=1)                     # (Bt, F_pad)

    # bias + ReLU after max-pool (exact: per-channel bias, monotone ReLU).
    feats = jnp.maximum(feats + bc_ref[...], 0.0)

    # FC (padded rows/cols of wf are zero -> pad lanes contribute nothing).
    o_ref[...] = (jnp.dot(feats, wf_ref[...],
                          preferred_element_type=jnp.float32) + bf_ref[...])


# ---------------------------------------------------------------------------
# Parameter init (PyTorch-equivalent distributions, packed/padded for the kernel)
# ---------------------------------------------------------------------------
def init_params(key, vocab_size, embed_dim, KS, Co, labels):
    D = embed_dim
    keys = jax.random.split(key, 3 + 2 * len(KS))

    # Embedding (padding_idx=0 -> row 0 zeroed); stored bf16 (halves HBM traffic).
    emb = jax.random.normal(keys[0], (vocab_size, D), jnp.float32).at[0].set(0.0)

    C_total = sum(K * Co for K in KS)
    C_pad = _round_up(C_total, 128)
    F = len(KS) * Co
    F_pad = _round_up(F, 128)
    LBL_pad = _round_up(labels, 128)

    wc = jnp.zeros((D, C_pad), jnp.float32)
    bc = jnp.zeros((F_pad,), jnp.float32)
    col_offsets = []
    off = 0
    for i, K in enumerate(KS):
        fan_in = K * D
        bound = 1.0 / math.sqrt(fan_in)
        # Conv2d(1, Co, (K, D)) weight (Co, 1, K, D) with Ci squeezed -> (Co, K, D)
        w = jax.random.uniform(keys[1 + 2 * i], (Co, K, D), jnp.float32,
                               -bound, bound)
        b = jax.random.uniform(keys[2 + 2 * i], (Co,), jnp.float32,
                               -bound, bound)
        # column (off + k*Co + c) <- w[c, k, :]
        wk = jnp.transpose(w, (1, 0, 2)).reshape(K * Co, D).T   # (D, K*Co)
        wc = wc.at[:, off:off + K * Co].set(wk)
        bc = bc.at[i * Co:(i + 1) * Co].set(b)
        col_offsets.append(off)
        off += K * Co

    # Linear(len(KS)*Co, labels), stored transposed + zero-padded to lane widths.
    bound = 1.0 / math.sqrt(F)
    fw = jax.random.uniform(keys[-2], (labels, F), jnp.float32, -bound, bound)
    fb = jax.random.uniform(keys[-1], (labels,), jnp.float32, -bound, bound)
    wf = jnp.zeros((F_pad, LBL_pad), jnp.float32).at[:F, :labels].set(fw.T)
    bf = jnp.zeros((1, LBL_pad), jnp.float32).at[0, :labels].set(fb)

    params = {
        "embedding": emb.astype(jnp.bfloat16),   # (V, D) bf16
        "conv_w": wc.astype(jnp.bfloat16),       # (D, C_pad) bf16
        "conv_b": bc.reshape(1, F_pad),          # (1, F_pad) f32
        "fc_w": wf,                              # (F_pad, LBL_pad) f32
        "fc_b": bf,                              # (1, LBL_pad) f32
    }
    meta = {"col_offsets": tuple(col_offsets)}
    return params, meta


# ---------------------------------------------------------------------------
# Forward
# ---------------------------------------------------------------------------
def cnn_classifier_forward(params, meta, x, KS, Co, labels, batch_tile=256):
    # x: (B, L) int32 token ids.
    B, L = x.shape
    D = params["embedding"].shape[1]
    C_pad = params["conv_w"].shape[1]
    F_pad = params["conv_b"].shape[1]
    LBL_pad = params["fc_w"].shape[1]

    # Embedding gather (XLA); dropout(p=0.2) is identity at eval.
    # TODO(synk): fold the gather into the kernel (scalar-prefetch row index_map
    # / manual DMA gather) to avoid materializing embeds in HBM; and tile L for
    # very long sequences.
    embeds = jnp.take(params["embedding"], x, axis=0)           # (B, L, D) bf16

    Bt = B if B <= batch_tile else batch_tile                   # batch tile
    grid = (pl.cdiv(B, Bt),)

    kernel = functools.partial(_fused_cnn_kernel, KS=tuple(KS), Co=Co,
                               col_offsets=meta["col_offsets"])

    logits_pad = pl.pallas_call(
        kernel,
        out_shape=jax.ShapeDtypeStruct((B, LBL_pad), jnp.float32),
        grid=grid,
        in_specs=[
            pl.BlockSpec((Bt, L, D), lambda i: (i, 0, 0)),      # embeds (tiled B)
            pl.BlockSpec((D, C_pad), lambda i: (0, 0)),         # fused conv W
            pl.BlockSpec((1, F_pad), lambda i: (0, 0)),         # conv biases
            pl.BlockSpec((F_pad, LBL_pad), lambda i: (0, 0)),   # fc W
            pl.BlockSpec((1, LBL_pad), lambda i: (0, 0)),       # fc bias
        ],
        out_specs=pl.BlockSpec((Bt, LBL_pad), lambda i: (i, 0)),
        compiler_params=pltpu.CompilerParams(
            dimension_semantics=("parallel",),
            vmem_limit_bytes=32 * 1024 * 1024,
        ),
    )(embeds, params["conv_w"], params["conv_b"],
      params["fc_w"], params["fc_b"])

    return logits_pad[:, :labels]


# ---------------------------------------------------------------------------
# Pure-JAX reference (PyTorch op order: bias + ReLU before max-pool) for a
# smoke correctness check against the fused kernel.
# ---------------------------------------------------------------------------
def _reference_forward(params, meta, x, KS, Co, labels):
    e = jnp.take(params["embedding"].astype(jnp.float32), x, axis=0)
    wc = params["conv_w"].astype(jnp.float32)
    bc = params["conv_b"][0]
    B, L, D = e.shape
    pooled = []
    for i, K in enumerate(KS):
        off = meta["col_offsets"][i]
        L_out = L - K + 1
        w_i = wc[:, off:off + K * Co].reshape(D, K, Co).transpose(1, 0, 2)
        conv = jnp.zeros((B, L_out, Co), jnp.float32)
        for k in range(K):
            conv = conv + jnp.einsum("bld,dc->blc", e[:, k:k + L_out, :], w_i[k])
        conv = jax.nn.relu(conv + bc[i * Co:(i + 1) * Co][None, None, :])
        pooled.append(jnp.max(conv, axis=1))
    feats = jnp.concatenate(pooled, axis=1)
    F = len(KS) * Co
    return feats @ params["fc_w"][:F, :labels] + params["fc_b"][0, :labels]


# ---------------------------------------------------------------------------
if __name__ == "__main__":
    vocab_size, embed_dim, KS, Co, labels = 100, 32, (3, 4, 5), 8, 5
    B, L = 2, 16

    key = jax.random.PRNGKey(0)
    pkey, xkey = jax.random.split(key)
    params, meta = init_params(pkey, vocab_size, embed_dim, KS, Co, labels)
    x = jax.random.randint(xkey, (B, L), 0, vocab_size, dtype=jnp.int32)

    logits = cnn_classifier_forward(params, meta, x, KS, Co, labels)
    jax.block_until_ready(logits)
    assert logits.shape == (B, labels) and logits.dtype == jnp.float32

    ref = _reference_forward(params, meta, x, KS, Co, labels)
    assert jnp.allclose(logits, ref, rtol=1e-2, atol=1e-2), (logits, ref)

    print("KERNEL_OK")
</pallas_src>

<mosaic_0001>
module attributes {stable_mosaic.version = 11 : i64} {
  func.func @_fused_cnn_kernel(%arg0: i32, %arg1: memref<2x16x32xbf16, #tpu.memory_space<vmem>>, %arg2: memref<32x128xbf16, #tpu.memory_space<vmem>>, %arg3: memref<1x128xf32, #tpu.memory_space<vmem>>, %arg4: memref<128x128xf32, #tpu.memory_space<vmem>>, %arg5: memref<1x128xf32, #tpu.memory_space<vmem>>, %arg6: memref<2x128xf32, #tpu.memory_space<vmem>>) attributes {dimension_semantics = [#tpu.dimension_semantics<parallel>], iteration_bounds = array<i64: 1>, scalar_prefetch = 0 : i64, scratch_operands = 0 : i64, tpu.core_type = #tpu.core_type<tc>, window_params = [{transform_indices = @transform_0, window_bounds = array<i64: 2, 16, 32>}, {pipeline_mode = #tpu.pipeline_mode<synchronous>, transform_indices = @transform_1, window_bounds = array<i64: 32, 128>}, {pipeline_mode = #tpu.pipeline_mode<synchronous>, transform_indices = @transform_2, window_bounds = array<i64: 1, 128>}, {pipeline_mode = #tpu.pipeline_mode<synchronous>, transform_indices = @transform_3, window_bounds = array<i64: 128, 128>}, {pipeline_mode = #tpu.pipeline_mode<synchronous>, transform_indices = @transform_4, window_bounds = array<i64: 1, 128>}, {transform_indices = @transform_5, window_bounds = array<i64: 2, 128>}]} {
    %c0 = arith.constant 0 : index
    %c0_0 = arith.constant 0 : index
    %c0_1 = arith.constant 0 : index
    %0 = vector.load %arg1[%c0, %c0_0, %c0_1] : memref<2x16x32xbf16, #tpu.memory_space<vmem>>, vector<2x16x32xbf16>
    %1 = vector.shape_cast %0 : vector<2x16x32xbf16> to vector<32x32xbf16>
    %c0_2 = arith.constant 0 : index
    %c0_3 = arith.constant 0 : index
    %2 = vector.load %arg2[%c0_2, %c0_3] : memref<32x128xbf16, #tpu.memory_space<vmem>>, vector<32x128xbf16>
    %cst = arith.constant dense<0.000000e+00> : vector<32x128xf32>
    %3 = tpu.matmul %1, %2, %cst {dimension_numbers = #tpu.dot_dimension_numbers<[1], [0], [0], [1], [0, 0, 1, 1], [], []>} : vector<32x32xbf16>, vector<32x128xbf16>, vector<32x128xf32> -> vector<32x128xf32>
    %4 = vector.shape_cast %3 : vector<32x128xf32> to vector<2x16x128xf32>
    %5 = vector.extract_strided_slice %4 {offsets = [0, 0, 0], sizes = [2, 14, 8], strides = [1, 1, 1]} : vector<2x16x128xf32> to vector<2x14x8xf32>
    %6 = vector.extract_strided_slice %4 {offsets = [0, 1, 8], sizes = [2, 14, 8], strides = [1, 1, 1]} : vector<2x16x128xf32> to vector<2x14x8xf32>
    %7 = arith.addf %5, %6 : vector<2x14x8xf32>
    %8 = vector.extract_strided_slice %4 {offsets = [0, 2, 16], sizes = [2, 14, 8], strides = [1, 1, 1]} : vector<2x16x128xf32> to vector<2x14x8xf32>
    %9 = arith.addf %7, %8 : vector<2x14x8xf32>
    %cst_4 = arith.constant dense<0xFF800000> : vector<2x8xf32>
    %10 = vector.multi_reduction <maximumf>, %9, %cst_4 [1] : vector<2x14x8xf32> to vector<2x8xf32>
    %11 = vector.extract_strided_slice %4 {offsets = [0, 0, 24], sizes = [2, 13, 8], strides = [1, 1, 1]} : vector<2x16x128xf32> to vector<2x13x8xf32>
    %12 = vector.extract_strided_slice %4 {offsets = [0, 1, 32], sizes = [2, 13, 8], strides = [1, 1, 1]} : vector<2x16x128xf32> to vector<2x13x8xf32>
    %13 = arith.addf %11, %12 : vector<2x13x8xf32>
    %14 = vector.extract_strided_slice %4 {offsets = [0, 2, 40], sizes = [2, 13, 8], strides = [1, 1, 1]} : vector<2x16x128xf32> to vector<2x13x8xf32>
    %15 = arith.addf %13, %14 : vector<2x13x8xf32>
    %16 = vector.extract_strided_slice %4 {offsets = [0, 3, 48], sizes = [2, 13, 8], strides = [1, 1, 1]} : vector<2x16x128xf32> to vector<2x13x8xf32>
    %17 = arith.addf %15, %16 : vector<2x13x8xf32>
    %cst_5 = arith.constant dense<0xFF800000> : vector<2x8xf32>
    %18 = vector.multi_reduction <maximumf>, %17, %cst_5 [1] : vector<2x13x8xf32> to vector<2x8xf32>
    %19 = vector.extract_strided_slice %4 {offsets = [0, 0, 56], sizes = [2, 12, 8], strides = [1, 1, 1]} : vector<2x16x128xf32> to vector<2x12x8xf32>
    %20 = vector.extract_strided_slice %4 {offsets = [0, 1, 64], sizes = [2, 12, 8], strides = [1, 1, 1]} : vector<2x16x128xf32> to vector<2x12x8xf32>
    %21 = arith.addf %19, %20 : vector<2x12x8xf32>
    %22 = vector.extract_strided_slice %4 {offsets = [0, 2, 72], sizes = [2, 12, 8], strides = [1, 1, 1]} : vector<2x16x128xf32> to vector<2x12x8xf32>
    %23 = arith.addf %21, %22 : vector<2x12x8xf32>
    %24 = vector.extract_strided_slice %4 {offsets = [0, 3, 80], sizes = [2, 12, 8], strides = [1, 1, 1]} : vector<2x16x128xf32> to vector<2x12x8xf32>
    %25 = arith.addf %23, %24 : vector<2x12x8xf32>
    %26 = vector.extract_strided_slice %4 {offsets = [0, 4, 88], sizes = [2, 12, 8], strides = [1, 1, 1]} : vector<2x16x128xf32> to vector<2x12x8xf32>
    %27 = arith.addf %25, %26 : vector<2x12x8xf32>
    %cst_6 = arith.constant dense<0xFF800000> : vector<2x8xf32>
    %28 = vector.multi_reduction <maximumf>, %27, %cst_6 [1] : vector<2x12x8xf32> to vector<2x8xf32>
    %cst_7 = arith.constant 0.000000e+00 : f32
    %29 = vector.broadcast %cst_7 : f32 to vector<2x104xf32>
    %30 = tpu.concatenate %10, %18, %28, %29 in 1 : vector<2x8xf32>, vector<2x8xf32>, vector<2x8xf32>, vector<2x104xf32> -> vector<2x128xf32>
    %c0_8 = arith.constant 0 : index
    %c0_9 = arith.constant 0 : index
    %31 = vector.load %arg3[%c0_8, %c0_9] : memref<1x128xf32, #tpu.memory_space<vmem>>, vector<1x128xf32>
    %32 = vector.broadcast %31 : vector<1x128xf32> to vector<2x128xf32>
    %33 = arith.addf %30, %32 : vector<2x128xf32>
    %cst_10 = arith.constant 0.000000e+00 : f32
    %34 = vector.broadcast %cst_10 : f32 to vector<2x128xf32>
    %35 = arith.maximumf %33, %34 : vector<2x128xf32>
    %c0_11 = arith.constant 0 : index
    %c0_12 = arith.constant 0 : index
    %36 = vector.load %arg4[%c0_11, %c0_12] : memref<128x128xf32, #tpu.memory_space<vmem>>, vector<128x128xf32>
    %cst_13 = arith.constant dense<0.000000e+00> : vector<2x128xf32>
    %37 = tpu.matmul %35, %36, %cst_13 {dimension_numbers = #tpu.dot_dimension_numbers<[1], [0], [0], [1], [0, 0, 1, 1], [], []>} : vector<2x128xf32>, vector<128x128xf32>, vector<2x128xf32> -> vector<2x128xf32>
    %c0_14 = arith.constant 0 : index
    %c0_15 = arith.constant 0 : index
    %38 = vector.load %arg5[%c0_14, %c0_15] : memref<1x128xf32, #tpu.memory_space<vmem>>, vector<1x128xf32>
    %39 = vector.broadcast %38 : vector<1x128xf32> to vector<2x128xf32>
    %40 = arith.addf %37, %39 : vector<2x128xf32>
    %c0_16 = arith.constant 0 : index
    %c0_17 = arith.constant 0 : index
    %41 = vector.load %arg6[%c0_16, %c0_17] : memref<2x128xf32, #tpu.memory_space<vmem>>, vector<2x128xf32>
    tpu.vector_store %arg6[%c0_16, %c0_17], %40 {strides = array<i32>} : memref<2x128xf32, #tpu.memory_space<vmem>>, vector<2x128xf32>,
    return
  }
  func.func @transform_0(%arg0: i32) -> (i32, i32, i32) {
    %c0_i32 = arith.constant 0 : i32
    %c0_i32_0 = arith.constant 0 : i32
    %c0_i32_1 = arith.constant 0 : i32
    return %arg0, %c0_i32, %c0_i32_0 : i32, i32, i32
  }
  func.func @transform_1(%arg0: i32) -> (i32, i32) {
    %c0_i32 = arith.constant 0 : i32
    %c0_i32_0 = arith.constant 0 : i32
    %c0_i32_1 = arith.constant 0 : i32
    return %c0_i32, %c0_i32_0 : i32, i32
  }
  func.func @transform_2(%arg0: i32) -> (i32, i32) {
    %c0_i32 = arith.constant 0 : i32
    %c0_i32_0 = arith.constant 0 : i32
    %c0_i32_1 = arith.constant 0 : i32
    return %c0_i32, %c0_i32_0 : i32, i32
  }
  func.func @transform_3(%arg0: i32) -> (i32, i32) {
    %c0_i32 = arith.constant 0 : i32
    %c0_i32_0 = arith.constant 0 : i32
    %c0_i32_1 = arith.constant 0 : i32
    return %c0_i32, %c0_i32_0 : i32, i32
  }
  func.func @transform_4(%arg0: i32) -> (i32, i32) {
    %c0_i32 = arith.constant 0 : i32
    %c0_i32_0 = arith.constant 0 : i32
    %c0_i32_1 = arith.constant 0 : i32
    return %c0_i32, %c0_i32_0 : i32, i32
  }
  func.func @transform_5(%arg0: i32) -> (i32, i32) {
    %c0_i32 = arith.constant 0 : i32
    %c0_i32_0 = arith.constant 0 : i32
    return %arg0, %c0_i32 : i32, i32
  }
}

</mosaic_0001>

<bundles_post_ra>
// kernel: tpu_custom_call.1
= control target key start
LH: loop header
LB: loop body
LE: loop exit
PB: predicated region body
PF: predicated region fallthrough
CT: control target
= control target key end

     0   :  { %10 = vsyncpa [#allocation3], 0  ;;  %s756_s0 = inlined_call_operand.hbm [shape: bf16[2,16,32], index: 0, kind: input, shape index: {}]   ;;  %s757_s1 = inlined_call_operand.hbm [shape: bf16[32,128], index: 1, kind: input, shape index: {}]   ;;  %s758_s2 = inlined_call_operand.vmem [shape: f32[1,128], index: 2, kind: input, shape index: {}]   ;;  %s759_s3 = inlined_call_operand.hbm [shape: f32[128,128], index: 3, kind: input, shape index: {}]   ;;  %s760_s4 = inlined_call_operand.vmem [shape: f32[1,128], index: 4, kind: input, shape index: {}]   ;;  %s761_s5 = inlined_call_operand.hbm [shape: f32[2,128], index: 5, kind: output, shape index: {}]  }
   0x1   :  { %11 = vsyncpa [#allocation6], 0 }
   0x2   :  { %12 = vsyncpa [#allocation4], 0  ;;  %s623_s18 = smov [#allocation5]   ;;  %s624_s20 = smov [#allocation2]  }
   0x3   :  { %s30_s19 = sshll.u32 %s623_s18, 4  ;;  %s18_s21 = sshll.u32 %s624_s20, 4  ;;  %s31_s19 = int_to_ptr.vmem [resolvable:$true] %s30_s19  ;;  %s19_s21 = int_to_ptr.vmem [resolvable:$true] %s18_s21 }
   0x4   :  { %s545_s22 = scalar_lea.vmem %s31_s19, 256  ;;  %p550_p1 = scmp.lt.s32.totalorder %s31_s19, %s31_s19 }
   0x5   :  { %p546_p0 = scmp.ne.s32.totalorder %s31_s19, %s545_s22  ;;  %p551_p2 = scmp.lt.s32.totalorder %s545_s22, %s545_s22 }
   0x7   :  { %p552_p3 = por %p551_p2, %p550_p1 }
   0x9   :  { %p553_p4 = pnand %p552_p3, %p546_p0 }
   0xb   :  { %556 = shalt.err (!%p553_p4)
}
   0xc   :  { %s625_s23 = smov 64   ;;  %s626_s24 = smov 4  }
   0xd   :  { %36 = dma.hbm_to_vmem [thread:$0]  %s757_s1, 256, %s31_s19, [#allocation6], %s625_s23, %s625_s23, %s626_s24  }
   0xe   :  { %s565_s27 = scalar_lea.vmem %s19_s21, 256  ;;  %p570_p6 = scmp.lt.s32.totalorder %s19_s21, %s19_s21 }
   0xf   :  { %p566_p5 = scmp.ne.s32.totalorder %s19_s21, %s565_s27  ;;  %p571_p7 = scmp.lt.s32.totalorder %s565_s27, %s565_s27 }
  0x11   :  { %p572_p8 = por %p571_p7, %p570_p6 }
  0x13   :  { %p573_p9 = pnand %p572_p8, %p566_p5 }
  0x15   :  { %576 = shalt.err (!%p573_p9)
}
  0x16   :  { %24 = dma.hbm_to_vmem [thread:$0]  %s756_s0, 256, %s19_s21, [#allocation3], %s625_s23, %s625_s23, %s626_s24  }
  0x17   :  { %s627_s30 = smov [#allocation7]  }
  0x18   :  { %s44_s6 = sshll.u32 %s627_s30, 4  ;;  %s45_s6 = int_to_ptr.vmem [resolvable:$true] %s44_s6 }
  0x19   :  { %s585_s7 = scalar_lea.vmem %s45_s6, 2048  ;;  %p590_p11 = scmp.lt.s32.totalorder %s45_s6, %s45_s6 }
  0x1a   :  { %p586_p10 = scmp.ne.s32.totalorder %s45_s6, %s585_s7  ;;  %p591_p12 = scmp.lt.s32.totalorder %s585_s7, %s585_s7 }
  0x1c   :  { %p592_p13 = por %p591_p12, %p590_p11 }
  0x1e   :  { %p593_p0 = pnand %p592_p13, %p586_p10 }
  0x20   :  { %596 = shalt.err (!%p593_p0)
}
  0x21   :  { %s628_s1 = smov 128   ;;  %s629_s8 = smov 8  }
  0x22   :  { %50 = dma.hbm_to_vmem [thread:$0]  %s759_s3, 2048, %s45_s6, [#allocation6], %s628_s1, %s628_s1, %s629_s8  }
  0x23   :  { %617 = dma.done.wait [#allocation3], 256  }
  0x24   :  { %618 = vsyncadd [#allocation3], 4294967040 }
  0x25   :  { %619 = dma.done.wait [#allocation6], 2304  }
  0x26   :  { %620 = vsyncadd [#allocation6], 4294964992  ;;  %v533_v0 = vld [vmem:[#allocation5 + $0x8] sm:$0xff]   ;;  %v534_v1 = vld [vmem:[#allocation5] sm:$0xff]   ;;  %vm93_vm0 = vcmask 261120   ;;  %vm176_vm1 = vcmask 1045504  }
  0x27   :  { %475 = vmatprep.subr.bf16.mxu0 %v533_v0  ;;  %v535_v2 = vld [vmem:[#allocation2] sm:$0xff]   ;;  %v536_v3 = vld [vmem:[#allocation2 + $0x8] sm:$0xff]   ;;  %s630_s0 = smov 120   ;;  %s631_s3 = smov 112   ;;  %vm219_vm2 = vcmask 1044480   ;;  %vm153_vm3 = vcmask 1046528  }
  0x28   :  { %476 = vmatpush3.bf16.msra.mxu0 %v533_v0  ;;  %479 = vmatprep.mubr.msk.bf16.mxu0 %vm93_vm0, %v535_v2  ;;  %s632_s11 = smov 104   ;;  %vm262_vm4 = vcmask 1043456   ;;  %s633_s12 = smov 96   ;;  %v351_v32 = vld [vmem:[#allocation7 + $0x78] sm:$0xff]  ;;  %v634_v33 = vmov 0.0   ;;  %v350_v34 = vld [vmem:[#allocation7 + $0x70] sm:$0xff] }
  0x29   :  { %477 = vmatprep.subr.bf16.mxu0 %v534_v1  ;;  %483 = vmatprep.subr.mxu1 %v634_v33  ;;  %v349_v35 = vld [vmem:[#allocation7 + $0x68] sm:$0xff]  ;;  %v348_v36 = vld [vmem:[#allocation7 + $0x60] sm:$0xff]  ;;  %v347_v37 = vld [vmem:[#allocation7 + $0x58] sm:$0xff]  ;;  %vm201_vm5 = vcmask 62464   ;;  %vm199_vm6 = vcmask 64512   ;;  %vm244_vm7 = vcmask 258240  }
  0x2a   :  { %484 = vmatpush3.msra.mxu1 %v351_v32  ;;  %v346_v38 = vld [vmem:[#allocation7 + $0x50] sm:$0xff]  ;;  %v345_v39 = vld [vmem:[#allocation7 + $0x48] sm:$0xff]  ;;  %v344_v40 = vld [vmem:[#allocation7 + $0x40] sm:$0xff]  ;;  %vm242_vm8 = vcmask 261312   ;;  %vm287_vm9 = vcmask 519616   ;;  %vm285_vm10 = vcmask 523712  }
  0x2b   :  { %485 = vmatprep.subr.mxu1 %v634_v33  ;;  %v343_v41 = vld [vmem:[#allocation7 + $0x38] sm:$0xff]  ;;  %vm307_vm11 = vcmask 1041409   ;;  %vm635_vm12 = vmmov 0   ;;  %s636_s13 = smov 88   ;;  %vm323_vm13 = vcmask 130048   ;;  %vm325_vm14 = vcmask 195584  }
  0x2c   :  { %478 = vmatpush3.bf16.msra.mxu0 %v534_v1  ;;  %486 = vmatpush3.msra.mxu1 %v350_v34  ;;  %s637_s18 = smov [#allocation8]  }
  0x2d   :  { %487 = vmatprep.subr.mxu1 %v634_v33  ;;  %515 = vmatprep.mubr.msk.f32.mxu1 %vm635_vm12, %v634_v33  ;;  %s436_s19 = sshll.u32 %s637_s18, 4  ;;  %s437_s19 = int_to_ptr.vmem [resolvable:$true] %s436_s19 }
  0x2e   :  { %488 = vmatpush3.msra.mxu1 %v349_v35  ;;  %s597_s20 = scalar_lea.vmem %s437_s19, 32  ;;  %p602_p2 = scmp.lt.s32.totalorder %s437_s19, %s437_s19 }
  0x2f   :  { %480 = vmatmul.mubr.msk.bf16.vlgmr.msra.gmra.mxu0 %vm93_vm0, %v536_v3  ;;  %489 = vmatprep.subr.mxu1 %v634_v33  ;;  %p598_p1 = scmp.ne.s32.totalorder %s437_s19, %s597_s20  ;;  %p603_p3 = scmp.lt.s32.totalorder %s597_s20, %s597_s20 }
  0x30   :  { %490 = vmatpush3.msra.mxu1 %v348_v36 }
  0x31   :  { %491 = vmatprep.subr.mxu1 %v634_v33  ;;  %p604_p4 = por %p603_p3, %p602_p2 }
  0x32   :  { %492 = vmatpush3.msra.mxu1 %v347_v37 }
  0x33   :  { %493 = vmatprep.subr.mxu1 %v634_v33  ;;  %p605_p5 = pnand %p604_p4, %p598_p1 }
  0x34   :  { %494 = vmatpush3.msra.mxu1 %v346_v38 }
  0x35   :  { %495 = vmatprep.subr.mxu1 %v634_v33 }
  0x36   :  { %496 = vmatpush3.msra.mxu1 %v345_v39 }
  0x37   :  { %497 = vmatprep.subr.mxu1 %v634_v33 }
  0x38   :  { %498 = vmatpush3.msra.mxu1 %v344_v40 }
  0x39   :  { %499 = vmatprep.subr.mxu1 %v634_v33 }
  0x3a   :  { %500 = vmatpush3.msra.mxu1 %v343_v41 }
  0x3b   :  { %501 = vmatprep.subr.mxu1 %v634_v33 }
  0xef   :  { %v677_v4 = vpop.f32.mrf.mxu0 }
  0xf0   :  { %v180_v8 = vrot.slane %v677_v4, 2  ;;  %v223_v12 = vrot.slane %v677_v4, 3  ;;  %v157_v16 = vrot.slane %v677_v4, 1  ;;  %v266_v30 = vrot.slane %v677_v4, 4 }
  0xf1   :  { %v679_v5 = vpop.f32.mrf.mxu0 }
  0xf2   :  { %v154_v17 = vrot.slane %v679_v5, 1  ;;  %v177_v21 = vrot.slane %v679_v5, 2  ;;  %v220_v24 = vrot.slane %v679_v5, 3  ;;  %v263_v27 = vrot.slane %v679_v5, 4 }
  0xf3   :  { %v681_v6 = vpop.f32.mrf.mxu0 }
  0xf4   :  { %v158_v7 = vrot.slane %v681_v6, 1  ;;  %v181_v9 = vrot.slane %v681_v6, 2  ;;  %v224_v11 = vrot.slane %v681_v6, 3  ;;  %v267_v29 = vrot.slane %v681_v6, 4 }
  0xf5   :  { %v690_v13 = vpop.f32.mrf.mxu0 }
  0xf6   :  { %166 = vrot.lane.b32.xlu1 %v158_v7, %s630_s0  ;;  %v182_v10 = vsel %vm176_vm1, %v180_v8, %v181_v9  ;;  %v225_v14 = vsel %vm219_vm2, %v223_v12, %v224_v11  ;;  %v155_v15 = vrot.slane %v690_v13, 1  ;;  %v159_v18 = vsel %vm153_vm3, %v157_v16, %v158_v7 }
  0xf7   :  { %187 = vrot.lane.b32.xlu0 %v182_v10, %s631_s3  ;;  %v178_v20 = vrot.slane %v690_v13, 2  ;;  %v221_v23 = vrot.slane %v690_v13, 3  ;;  %v264_v26 = vrot.slane %v690_v13, 4  ;;  %v268_v31 = vsel %vm262_vm4, %v266_v30, %v267_v29  ;;  %v342_v30 = vld [vmem:[#allocation7 + $0x30] sm:$0xff] }
  0xf8   :  { %v156_v19 = vsel %vm153_vm3, %v154_v17, %v155_v15  ;;  %502 = vmatpush3.msra.mxu1 %v342_v30 }
  0xf9   :  { %v179_v22 = vsel %vm176_vm1, %v177_v21, %v178_v20  ;;  %v222_v25 = vsel %vm219_vm2, %v220_v24, %v221_v23  ;;  %v265_v28 = vsel %vm262_vm4, %v263_v27, %v264_v26  ;;  %503 = vmatprep.subr.mxu1 %v634_v33 }
  0xfa   :  { %189 = vrot.lane.b32.xlu1 %v181_v9, %s631_s3 }
  0xfb   :  { %230 = vrot.lane.b32.xlu0 %v225_v14, %s632_s11 }
  0xfe   :  { %232 = vrot.lane.b32.xlu1 %v224_v11, %s632_s11 }
  0xff   :  { %162 = vrot.lane.b32.xlu0 %v155_v15, %s630_s0 }
 0x102   :  { %164 = vrot.lane.b32.xlu1 %v159_v18, %s630_s0 }
 0x103   :  { %160 = vrot.lane.b32.xlu0 %v156_v19, %s630_s0 }
 0x106   :  { %185 = vrot.lane.b32.xlu1 %v178_v20, %s631_s3 }
 0x107   :  { %183 = vrot.lane.b32.xlu0 %v179_v22, %s631_s3 }
 0x10a   :  { %228 = vrot.lane.b32.xlu1 %v221_v23, %s632_s11 }
 0x10b   :  { %226 = vrot.lane.b32.xlu0 %v222_v25, %s632_s11 }
 0x10e   :  { %271 = vrot.lane.b32.xlu1 %v264_v26, %s633_s12 }
 0x10f   :  { %269 = vrot.lane.b32.xlu0 %v265_v28, %s633_s12 }
 0x112   :  { %275 = vrot.lane.b32.xlu1 %v267_v29, %s633_s12 }
 0x113   :  { %273 = vrot.lane.b32.xlu0 %v268_v31, %s633_s12  ;;  %v341_v31 = vld [vmem:[#allocation7 + $0x28] sm:$0xff] }
 0x114   :  { %504 = vmatpush3.msra.mxu1 %v341_v31 }
 0x115   :  { %505 = vmatprep.subr.mxu1 %v634_v33 }
 0x168   :  { %v167_v42 = vpop.permute.xlu1 %166 }
 0x169   :  { %v188_v43 = vpop.permute.xlu0 %187  ;;  %v175_v48 = vadd.f32 %v681_v6, %v167_v42  ;;  %v340_v42 = vld [vmem:[#allocation7 + $0x20] sm:$0xff] }
 0x16a   :  { %506 = vmatpush3.msra.mxu1 %v340_v42 }
 0x16b   :  { %507 = vmatprep.subr.mxu1 %v634_v33 }
 0x16c   :  { %v190_v44 = vpop.permute.xlu1 %189 }
 0x16d   :  { %v231_v45 = vpop.permute.xlu0 %230  ;;  %v198_v50 = vadd.f32 %v190_v44, %v175_v48  ;;  %v339_v48 = vld [vmem:[#allocation7 + $0x18] sm:$0xff] }
 0x16e   :  { %508 = vmatpush3.msra.mxu1 %v339_v48 }
 0x16f   :  { %v211_v58 = vsel %vm201_vm5, %v198_v50, -inf  ;;  %509 = vmatprep.subr.mxu1 %v634_v33 }
 0x170   :  { %v233_v46 = vpop.permute.xlu1 %232 }
 0x171   :  { %v163_v47 = vpop.permute.xlu0 %162  ;;  %v241_v53 = vadd.f32 %v233_v46, %v198_v50 }
 0x172   :  { %v173_v54 = vadd.f32 %v163_v47, %v690_v13 }
 0x173   :  { %v254_v1 = vsel %vm244_vm7, %v241_v53, -inf }
 0x174   :  { %v165_v49 = vpop.permute.xlu1 %164 }
 0x175   :  { %v174_v51 = vadd.f32 %v677_v4, %v165_v49  ;;  %v161_v52 = vpop.permute.xlu0 %160 }
 0x176   :  { %v172_v56 = vadd.f32 %v161_v52, %v679_v5 }
 0x177   :  { %v197_v55 = vadd.f32 %v188_v43, %v174_v51 }
 0x178   :  { %v186_v57 = vpop.permute.xlu1 %185 }
 0x179   :  { %v196_v59 = vadd.f32 %v186_v57, %v173_v54  ;;  %v210_v60 = vsel %vm199_vm6, %v197_v55, -inf  ;;  %v184_v61 = vpop.permute.xlu0 %183  ;;  %v240_v62 = vadd.f32 %v231_v45, %v197_v55 }
 0x17a   :  { %v212_v63 = vmax.f32 %v210_v60, %v211_v58  ;;  %v195_v0 = vadd.f32 %v184_v61, %v172_v56  ;;  %v338_v61 = vld [vmem:[#allocation7 + $0x10] sm:$0xff] }
 0x17b   :  { %v202_v2 = vsel %vm201_vm5, %v196_v59, -inf  ;;  %v253_v3 = vsel %vm242_vm8, %v240_v62, -inf  ;;  %510 = vmatpush3.msra.mxu1 %v338_v61 }
 0x17c   :  { %v213_v4 = vrot.slane %v212_v63, 4  ;;  %v200_v5 = vsel %vm199_vm6, %v195_v0, -inf  ;;  %v229_v6 = vpop.permute.xlu1 %228  ;;  %v255_v7 = vmax.f32 %v253_v3, %v254_v1  ;;  %v337_v1 = vld [vmem:[#allocation7 + $0x8] sm:$0xff]  ;;  %511 = vmatprep.subr.mxu1 %v634_v33 }
 0x17d   :  { %v203_v8 = vmax.f32 %v200_v5, %v202_v2  ;;  %v239_v9 = vadd.f32 %v229_v6, %v196_v59  ;;  %v227_v10 = vpop.permute.xlu0 %226  ;;  %v336_v2 = vld [vmem:[#allocation7] sm:$0xff]  ;;  %512 = vmatpush3.msra.mxu1 %v337_v1 }
 0x17e   :  { %v214_v11 = vmax.f32 %v212_v63, %v213_v4  ;;  %v238_v12 = vadd.f32 %v227_v10, %v195_v0  ;;  %v256_v13 = vrot.slane %v255_v7, 4  ;;  %513 = vmatprep.subr.mxu1 %v634_v33 }
 0x17f   :  { %v204_v14 = vrot.slane %v203_v8, 4  ;;  %v245_v15 = vsel %vm244_vm7, %v239_v9, -inf  ;;  %514 = vmatpush3.msra.mxu1 %v336_v2 }
 0x180   :  { %v215_v16 = vrot.slane %v214_v11, 2  ;;  %v243_v17 = vsel %vm242_vm8, %v238_v12, -inf  ;;  %v272_v18 = vpop.permute.xlu1 %271  ;;  %v257_v19 = vmax.f32 %v255_v7, %v256_v13  ;;  %v452_v13 = vld [vmem:[%s758_s2] ss:$0 sm:$0xff] }
 0x181   :  { %v205_v20 = vmax.f32 %v203_v8, %v204_v14  ;;  %v246_v21 = vmax.f32 %v243_v17, %v245_v15  ;;  %v282_v22 = vadd.f32 %v272_v18, %v239_v9  ;;  %v270_v23 = vpop.permute.xlu0 %269  ;;  %v453_v18 = vld [vmem:[%s760_s4] ss:$0 sm:$0xff] }
 0x182   :  { %v281_v24 = vadd.f32 %v270_v23, %v238_v12  ;;  %v258_v25 = vrot.slane %v257_v19, 2  ;;  %v216_v26 = vmax.f32 %v214_v11, %v215_v16 }
 0x183   :  { %v206_v27 = vrot.slane %v205_v20, 2  ;;  %v247_v28 = vrot.slane %v246_v21, 4  ;;  %v288_v29 = vsel %vm287_vm9, %v282_v22, -inf }
 0x184   :  { %v286_v32 = vsel %vm285_vm10, %v281_v24, -inf  ;;  %v276_v34 = vpop.permute.xlu1 %275  ;;  %v259_v35 = vmax.f32 %v257_v19, %v258_v25  ;;  %v217_v36 = vrot.slane %v216_v26, 1 }
 0x185   :  { %v207_v37 = vmax.f32 %v205_v20, %v206_v27  ;;  %v248_v38 = vmax.f32 %v246_v21, %v247_v28  ;;  %v289_v39 = vmax.f32 %v286_v32, %v288_v29  ;;  %v284_v40 = vadd.f32 %v276_v34, %v241_v53  ;;  %v274_v41 = vpop.permute.xlu0 %273 }
 0x186   :  { %v283_v43 = vadd.f32 %v274_v41, %v240_v62  ;;  %v260_v50 = vrot.slane %v259_v35, 1  ;;  %v218_v51 = vmax.f32 %v216_v26, %v217_v36 }
 0x187   :  { %v208_v44 = vrot.slane %v207_v37, 1  ;;  %v249_v45 = vrot.slane %v248_v38, 2  ;;  %v290_v46 = vrot.slane %v289_v39, 4  ;;  %v297_v47 = vsel %vm287_vm9, %v284_v40, -inf }
 0x188   :  { %v296_v49 = vsel %vm285_vm10, %v283_v43, -inf  ;;  %v261_v60 = vmax.f32 %v259_v35, %v260_v50 }
 0x189   :  { %v250_v52 = vmax.f32 %v248_v38, %v249_v45  ;;  %v291_v53 = vmax.f32 %v289_v39, %v290_v46  ;;  %v298_v54 = vmax.f32 %v296_v49, %v297_v47  ;;  %v209_v55 = vmax.f32 %v207_v37, %v208_v44 }
 0x18b   :  { %v292_v56 = vrot.slane %v291_v53, 2  ;;  %v299_v57 = vrot.slane %v298_v54, 4  ;;  %v251_v58 = vrot.slane %v250_v52, 1  ;;  %v308_v59 = vsel %vm307_vm11, %v218_v51, %v209_v55 }
 0x18d   :  { %v293_v62 = vmax.f32 %v291_v53, %v292_v56  ;;  %v300_v63 = vmax.f32 %v298_v54, %v299_v57  ;;  %v252_v0 = vmax.f32 %v250_v52, %v251_v58 }
 0x18f   :  { %v301_v3 = vrot.slane %v300_v63, 2  ;;  %v312_v4 = vsel %vm307_vm11, %v261_v60, %v252_v0  ;;  %v294_v6 = vrot.slane %v293_v62, 1 }
 0x190   :  { %313 = vrot.lane.b32.xlu0 %v312_v4, %s631_s3 }
 0x191   :  { %v302_v5 = vmax.f32 %v300_v63, %v301_v3  ;;  %v295_v8 = vmax.f32 %v293_v62, %v294_v6 }
 0x193   :  { %v303_v7 = vrot.slane %v302_v5, 1 }
 0x195   :  { %v304_v9 = vmax.f32 %v302_v5, %v303_v7 }
 0x197   :  { %v318_v10 = vsel %vm307_vm11, %v304_v9, %v295_v8 }
 0x198   :  { %319 = vrot.lane.b32.xlu1 %v318_v10, %s636_s13 }
 0x202   :  { %v314_v11 = vpop.permute.xlu0 %313 }
 0x203   :  { %v322_v12 = vsel %vm199_vm6, %v308_v59, %v314_v11 }
 0x20a   :  { %v320_v33 = vpop.permute.xlu1 %319 }
 0x20b   :  { %v324_v14 = vsel %vm323_vm13, %v322_v12, %v320_v33 }
 0x20c   :  { %v326_v15 = vsel %vm325_vm14, %v324_v14, 0.0 }
 0x20d   :  { %v334_v16 = vadd.f32 %v452_v13, %v326_v15 }
 0x20f   :  { %v335_v17 = vmax.f32 %v334_v16, 0.0 }
 0x211   :  { %516 = vmatmul.mubr.f32.vlgmr.msra.gmra.mxu1 %v335_v17 }
 0x2d1   :  { %v425_v19 = vpop.f32.mrf.mxu1 }
 0x2d2   :  { %v426_v20 = vadd.f32 %v453_v18, %v425_v19 }
 0x2d3   :  { %v517_v21 = vpop.f32.mrf.mxu1 }
 0x2d4   :  { %429 = vst [vmem:[#allocation8] sm:$0x3] %v426_v20 }
 0x2d5   :  { %608 = shalt.err (!%p605_p5)
}
 0x2d6   :  { %439 = dma.vmem_to_hbm [thread:$0]  %s437_s19, 32, %s761_s5, [#allocation4]  }
 0x2d7   :  { %621 = dma.done.wait [#allocation4], 32  }
 0x2d8   :  { %622 = vsyncadd [#allocation4], 4294967264 }
 0x2d9   :  { %443 = vsyncpa [#allocation3], 1 }
 0x2da   :  { %444 = vsyncpa [#allocation6], 1 }
 0x2db   :  { %445 = vsyncpa [#allocation4], 1 }

</bundles_post_ra>
